<compile_context>
chip_gen: v5e
topology: v5e:2x2
jax: 0.10.0
libtpu: 0.0.40
codegen_flags: <defaults>
</compile_context>

<pallas_src>
import functools

import jax
import jax.numpy as jnp
from jax.experimental import pallas as pl
from jax.experimental.pallas import tpu as pltpu

EPS = 1e-5          # torch.nn.BatchNorm1d default eps
NEG_SLOPE = 0.01    # torch.nn.LeakyReLU default negative_slope
SUBLANES = 8


def _round_up(x, m):
    return (x + m - 1) // m * m


def _fused_block_kernel(x_ref, w_ref, g_ref, b_ref, o_ref, *, n_batch, kernel_size):
    """Whole PeriodicConv1DBlock in one kernel.

    x_ref: (N*C, L)      f32  channel-padded input, flat lane-dense slab
    w_ref: (NL, C, K*C)  f32  W[l, o, k*C + i] = w_l[o, i, k] (layer-0 extra in-channels zeroed)
    g_ref: (NL, C, 1)    f32  BN gamma (padded channels -> 0)
    b_ref: (NL, C, 1)    f32  BN beta  (padded channels -> 0)
    o_ref: (N, C, L)     f32
    """
    NL, C, KC = w_ref.shape
    NC, L = x_ref.shape
    N = n_batch
    K = kernel_size
    pad = K // 2

    x = x_ref[...]                                             # (N*C, L)
    y = None
    for layer in range(NL):                                    # small static count -> unrolled
        w = w_ref[layer]                                       # (C, K*C)
        g = g_ref[layer]                                       # (C, 1)
        beta = b_ref[layer]                                    # (C, 1)

        # Circular conv: K lane-rolls on the whole slab (rows stay independent on the lane axis).
        rolled = [pltpu.roll(x, shift=(pad - k) % L, axis=1) for k in range(K)]

        # One (C, K*C) x (K*C, L) MXU dot per batch element (N dots per layer total).
        ys = []
        for n in range(N):
            xs_n = jnp.concatenate(
                [r[n * C:(n + 1) * C, :] for r in rolled], axis=0)      # (K*C, L), tile-aligned
            ys.append(jnp.dot(w, xs_n, preferred_element_type=jnp.float32))  # (C, L)
        y = jnp.stack(ys, axis=0)                              # (N, C, L)
        # conv bias intentionally omitted: train-mode BN mean-subtraction cancels it exactly.

        # BatchNorm1d (training-mode batch statistics over (N, L)), one reduction pass,
        # folded into a single affine, fused with LeakyReLU.
        mean = jnp.mean(y, axis=(0, 2), keepdims=True)         # (1, C, 1)
        msq = jnp.mean(y * y, axis=(0, 2), keepdims=True)      # (1, C, 1)
        var = msq - mean * mean                                # biased variance (PyTorch norm)
        scale = g[None, :, :] * jax.lax.rsqrt(var + EPS)       # (1, C, 1)
        shift = beta[None, :, :] - mean * scale                # (1, C, 1)
        y = y * scale + shift
        y = jnp.where(y > 0, y, NEG_SLOPE * y)                 # LeakyReLU

        x = y.reshape(N * C, L)                                # slab for next layer (free reshape)

    o_ref[...] = y
    # NOTE: at these sizes everything fits VMEM with no grid; for large N/L this kernel would
    # need a grid over N and L-tiling with halo columns (and vmem_limit_bytes) — esp. on v7x.


def pack_params(params, n_channels, kernel_size):
    """One-time repack of per-layer PyTorch-layout params into stacked kernel operands.

    params: list of (w (Cout,Cin,K), conv_bias (Cout,), gamma (Cout,), beta (Cout,)).
    Returns (w_all (NL,C,K*C), g_all (NL,C,1), b_all (NL,C,1)) with C = n_channels rounded up
    to a multiple of 8 (sublane alignment). The conv bias is dropped (cancelled by train-mode BN).
    """
    C = _round_up(n_channels, SUBLANES)
    K = kernel_size
    w_all, g_all, b_all = [], [], []
    for (w, _b_conv, gamma, beta) in params:
        cout, cin, _ = w.shape
        wp = jnp.zeros((C, C, K), jnp.float32).at[:cout, :cin, :].set(w.astype(jnp.float32))
        wp = jnp.transpose(wp, (0, 2, 1)).reshape(C, K * C)    # W[o, k*C + i] = w[o, i, k]
        w_all.append(wp)
        g_all.append(jnp.zeros((C,), jnp.float32).at[:cout].set(gamma.astype(jnp.float32)))
        b_all.append(jnp.zeros((C,), jnp.float32).at[:cout].set(beta.astype(jnp.float32)))
    return (jnp.stack(w_all, axis=0),
            jnp.stack(g_all, axis=0)[..., None],
            jnp.stack(b_all, axis=0)[..., None])


def periodic_conv1d_block(x, w_all, g_all, b_all, *, n_channels, kernel_size):
    """Applies the whole block with a single pallas_call. x: (N, Cin, L) -> (N, n_channels, L)."""
    N, c_in, L = x.shape
    NL, C_pad, _ = w_all.shape
    x_pad = jnp.zeros((N, C_pad, L), jnp.float32).at[:, :c_in, :].set(x.astype(jnp.float32))
    x_flat = x_pad.reshape(N * C_pad, L)

    kernel = functools.partial(_fused_block_kernel, n_batch=N, kernel_size=kernel_size)
    vmem = pl.BlockSpec(memory_space=pltpu.MemorySpace.VMEM)
    out = pl.pallas_call(
        kernel,
        out_shape=jax.ShapeDtypeStruct((N, C_pad, L), jnp.float32),
        in_specs=[vmem] * 4,
        out_specs=vmem,
    )(x_flat, w_all, g_all, b_all)
    return out[:, :n_channels, :]


def init_params(key, n_channels_in, n_channels, kernel_size, n_layers):
    """PyTorch-default-like init: conv U(-1/sqrt(fan_in), +), BN gamma=1 / beta=0."""
    params = []
    cin = n_channels_in
    for _ in range(n_layers + 1):
        key, kw, kb = jax.random.split(key, 3)
        fan_in = cin * kernel_size
        bound = float(1.0 / (fan_in ** 0.5))
        w = jax.random.uniform(kw, (n_channels, cin, kernel_size), jnp.float32, -bound, bound)
        b = jax.random.uniform(kb, (n_channels,), jnp.float32, -bound, bound)
        gamma = jnp.ones((n_channels,), jnp.float32)
        beta = jnp.zeros((n_channels,), jnp.float32)
        params.append((w, b, gamma, beta))
        cin = n_channels
    return params


# --- pure-JAX reference (faithful to PyTorch forward, incl. conv bias) ------
def _ref_layer(x, w, b, gamma, beta):
    K = w.shape[2]
    pad = K // 2
    acc = jnp.zeros((x.shape[0], w.shape[0], x.shape[2]), jnp.float32)
    for k in range(K):
        xs = jnp.roll(x, pad - k, axis=2)
        acc = acc + jnp.einsum("oi,nil->nol", w[:, :, k], xs)
    acc = acc + b[None, :, None]
    mean = acc.mean(axis=(0, 2), keepdims=True)
    var = ((acc - mean) ** 2).mean(axis=(0, 2), keepdims=True)
    y = (acc - mean) / jnp.sqrt(var + EPS) * gamma[None, :, None] + beta[None, :, None]
    return jnp.where(y > 0, y, NEG_SLOPE * y)


# TODO(synk): eval-mode BatchNorm (running_mean/running_var) parity is not implemented; the
# kernel matches the module's default train-mode forward (per-call batch statistics).

if __name__ == "__main__":
    # PeriodicConv1DBlock(n_channels_in=4, n_channels=8, kernel_size=5, n_layers=2) on (N, Cin, L).
    N, C_IN, C, K, L, N_LAYERS = 2, 4, 8, 5, 128, 2

    key = jax.random.PRNGKey(0)
    key, kx = jax.random.split(key)
    x = jax.random.normal(kx, (N, C_IN, L), jnp.float32)
    params = init_params(key, C_IN, C, K, N_LAYERS)

    # One-time param repack (kept out of the jitted per-forward path).
    w_all, g_all, b_all = pack_params(params, C, K)
    fwd = jax.jit(functools.partial(periodic_conv1d_block, n_channels=C, kernel_size=K))

    out = jax.block_until_ready(fwd(x, w_all, g_all, b_all))
    assert out.shape == (N, C, L)

    ref = x
    for p in params:
        ref = _ref_layer(ref, *p)
    max_err = float(jnp.max(jnp.abs(out - ref)))
    assert jnp.allclose(out, ref, atol=1e-2, rtol=1e-2), f"max_err={max_err}"

    print("KERNEL_OK")
</pallas_src>

<mosaic_0001>
module attributes {stable_mosaic.version = 11 : i64} {
  func.func @_fused_block_kernel(%arg0: memref<16x128xf32, #tpu.memory_space<vmem>>, %arg1: memref<3x8x40xf32, #tpu.memory_space<vmem>>, %arg2: memref<3x8x1xf32, #tpu.memory_space<vmem>>, %arg3: memref<3x8x1xf32, #tpu.memory_space<vmem>>, %arg4: memref<2x8x128xf32, #tpu.memory_space<vmem>>) attributes {dimension_semantics = [], scalar_prefetch = 0 : i64, scratch_operands = 0 : i64, tpu.core_type = #tpu.core_type<tc>} {
    %c0 = arith.constant 0 : index
    %c0_0 = arith.constant 0 : index
    %0 = vector.load %arg0[%c0, %c0_0] : memref<16x128xf32, #tpu.memory_space<vmem>>, vector<16x128xf32>
    %c0_1 = arith.constant 0 : index
    %c0_2 = arith.constant 0 : index
    %c0_3 = arith.constant 0 : index
    %1 = vector.load %arg1[%c0_1, %c0_2, %c0_3] : memref<3x8x40xf32, #tpu.memory_space<vmem>>, vector<1x8x40xf32>
    %2 = vector.shape_cast %1 : vector<1x8x40xf32> to vector<8x40xf32>
    %c0_4 = arith.constant 0 : index
    %c0_5 = arith.constant 0 : index
    %c0_6 = arith.constant 0 : index
    %3 = vector.load %arg2[%c0_4, %c0_5, %c0_6] : memref<3x8x1xf32, #tpu.memory_space<vmem>>, vector<1x8x1xf32>
    %4 = vector.shape_cast %3 : vector<1x8x1xf32> to vector<8x1xf32>
    %c0_7 = arith.constant 0 : index
    %c0_8 = arith.constant 0 : index
    %c0_9 = arith.constant 0 : index
    %5 = vector.load %arg3[%c0_7, %c0_8, %c0_9] : memref<3x8x1xf32, #tpu.memory_space<vmem>>, vector<1x8x1xf32>
    %6 = vector.shape_cast %5 : vector<1x8x1xf32> to vector<8x1xf32>
    %c2_i32 = arith.constant 2 : i32
    %7 = tpu.dynamic_rotate %0 by %c2_i32 dim 1 : vector<16x128xf32>, i32 -> vector<16x128xf32>
    %c1_i32 = arith.constant 1 : i32
    %8 = tpu.dynamic_rotate %0 by %c1_i32 dim 1 : vector<16x128xf32>, i32 -> vector<16x128xf32>
    %c0_i32 = arith.constant 0 : i32
    %9 = tpu.dynamic_rotate %0 by %c0_i32 dim 1 : vector<16x128xf32>, i32 -> vector<16x128xf32>
    %c127_i32 = arith.constant 127 : i32
    %10 = tpu.dynamic_rotate %0 by %c127_i32 dim 1 : vector<16x128xf32>, i32 -> vector<16x128xf32>
    %c126_i32 = arith.constant 126 : i32
    %11 = tpu.dynamic_rotate %0 by %c126_i32 dim 1 : vector<16x128xf32>, i32 -> vector<16x128xf32>
    %12 = vector.extract_strided_slice %7 {offsets = [0, 0], sizes = [8, 128], strides = [1, 1]} : vector<16x128xf32> to vector<8x128xf32>
    %13 = vector.extract_strided_slice %8 {offsets = [0, 0], sizes = [8, 128], strides = [1, 1]} : vector<16x128xf32> to vector<8x128xf32>
    %14 = vector.extract_strided_slice %9 {offsets = [0, 0], sizes = [8, 128], strides = [1, 1]} : vector<16x128xf32> to vector<8x128xf32>
    %15 = vector.extract_strided_slice %10 {offsets = [0, 0], sizes = [8, 128], strides = [1, 1]} : vector<16x128xf32> to vector<8x128xf32>
    %16 = vector.extract_strided_slice %11 {offsets = [0, 0], sizes = [8, 128], strides = [1, 1]} : vector<16x128xf32> to vector<8x128xf32>
    %17 = tpu.concatenate %12, %13, %14, %15, %16 in 0 : vector<8x128xf32>, vector<8x128xf32>, vector<8x128xf32>, vector<8x128xf32>, vector<8x128xf32> -> vector<40x128xf32>
    %cst = arith.constant dense<0.000000e+00> : vector<8x128xf32>
    %18 = tpu.matmul %2, %17, %cst {dimension_numbers = #tpu.dot_dimension_numbers<[1], [0], [0], [1], [0, 0, 1, 1], [], []>} : vector<8x40xf32>, vector<40x128xf32>, vector<8x128xf32> -> vector<8x128xf32>
    %19 = vector.extract_strided_slice %7 {offsets = [8, 0], sizes = [8, 128], strides = [1, 1]} : vector<16x128xf32> to vector<8x128xf32>
    %20 = vector.extract_strided_slice %8 {offsets = [8, 0], sizes = [8, 128], strides = [1, 1]} : vector<16x128xf32> to vector<8x128xf32>
    %21 = vector.extract_strided_slice %9 {offsets = [8, 0], sizes = [8, 128], strides = [1, 1]} : vector<16x128xf32> to vector<8x128xf32>
    %22 = vector.extract_strided_slice %10 {offsets = [8, 0], sizes = [8, 128], strides = [1, 1]} : vector<16x128xf32> to vector<8x128xf32>
    %23 = vector.extract_strided_slice %11 {offsets = [8, 0], sizes = [8, 128], strides = [1, 1]} : vector<16x128xf32> to vector<8x128xf32>
    %24 = tpu.concatenate %19, %20, %21, %22, %23 in 0 : vector<8x128xf32>, vector<8x128xf32>, vector<8x128xf32>, vector<8x128xf32>, vector<8x128xf32> -> vector<40x128xf32>
    %cst_10 = arith.constant dense<0.000000e+00> : vector<8x128xf32>
    %25 = tpu.matmul %2, %24, %cst_10 {dimension_numbers = #tpu.dot_dimension_numbers<[1], [0], [0], [1], [0, 0, 1, 1], [], []>} : vector<8x40xf32>, vector<40x128xf32>, vector<8x128xf32> -> vector<8x128xf32>
    %26 = vector.shape_cast %18 : vector<8x128xf32> to vector<1x8x128xf32>
    %27 = vector.shape_cast %25 : vector<8x128xf32> to vector<1x8x128xf32>
    %28 = tpu.concatenate %26, %27 in 0 : vector<1x8x128xf32>, vector<1x8x128xf32> -> vector<2x8x128xf32>
    %cst_11 = arith.constant dense<0.000000e+00> : vector<8xf32>
    %29 = vector.multi_reduction <add>, %28, %cst_11 [0, 2] : vector<2x8x128xf32> to vector<8xf32>
    %30 = vector.shape_cast %29 : vector<8xf32> to vector<1x8x1xf32>
    %cst_12 = arith.constant 2.560000e+02 : f32
    %31 = vector.broadcast %cst_12 : f32 to vector<1x8x1xf32>
    %32 = arith.divf %30, %31 : vector<1x8x1xf32>
    %33 = arith.mulf %28, %28 : vector<2x8x128xf32>
    %cst_13 = arith.constant dense<0.000000e+00> : vector<8xf32>
    %34 = vector.multi_reduction <add>, %33, %cst_13 [0, 2] : vector<2x8x128xf32> to vector<8xf32>
    %35 = vector.shape_cast %34 : vector<8xf32> to vector<1x8x1xf32>
    %cst_14 = arith.constant 2.560000e+02 : f32
    %36 = vector.broadcast %cst_14 : f32 to vector<1x8x1xf32>
    %37 = arith.divf %35, %36 : vector<1x8x1xf32>
    %38 = arith.mulf %32, %32 : vector<1x8x1xf32>
    %39 = arith.subf %37, %38 : vector<1x8x1xf32>
    %40 = vector.shape_cast %4 : vector<8x1xf32> to vector<1x8x1xf32>
    %cst_15 = arith.constant 9.99999974E-6 : f32
    %41 = vector.broadcast %cst_15 : f32 to vector<1x8x1xf32>
    %42 = arith.addf %39, %41 : vector<1x8x1xf32>
    %43 = math.rsqrt %42 : vector<1x8x1xf32>
    %44 = arith.mulf %40, %43 : vector<1x8x1xf32>
    %45 = vector.shape_cast %6 : vector<8x1xf32> to vector<1x8x1xf32>
    %46 = arith.mulf %32, %44 : vector<1x8x1xf32>
    %47 = arith.subf %45, %46 : vector<1x8x1xf32>
    %48 = vector.broadcast %44 : vector<1x8x1xf32> to vector<2x8x128xf32>
    %49 = arith.mulf %28, %48 : vector<2x8x128xf32>
    %50 = vector.broadcast %47 : vector<1x8x1xf32> to vector<2x8x128xf32>
    %51 = arith.addf %49, %50 : vector<2x8x128xf32>
    %cst_16 = arith.constant 0.000000e+00 : f32
    %52 = vector.broadcast %cst_16 : f32 to vector<2x8x128xf32>
    %53 = arith.cmpf ogt, %51, %52 : vector<2x8x128xf32>
    %cst_17 = arith.constant 0.00999999977 : f32
    %54 = vector.broadcast %cst_17 : f32 to vector<2x8x128xf32>
    %55 = arith.mulf %54, %51 : vector<2x8x128xf32>
    %56 = arith.select %53, %51, %55 : vector<2x8x128xi1>, vector<2x8x128xf32>
    %57 = vector.shape_cast %56 : vector<2x8x128xf32> to vector<16x128xf32>
    %c1 = arith.constant 1 : index
    %c0_18 = arith.constant 0 : index
    %c0_19 = arith.constant 0 : index
    %58 = vector.load %arg1[%c1, %c0_18, %c0_19] : memref<3x8x40xf32, #tpu.memory_space<vmem>>, vector<1x8x40xf32>
    %59 = vector.shape_cast %58 : vector<1x8x40xf32> to vector<8x40xf32>
    %c1_20 = arith.constant 1 : index
    %c0_21 = arith.constant 0 : index
    %c0_22 = arith.constant 0 : index
    %60 = vector.load %arg2[%c1_20, %c0_21, %c0_22] : memref<3x8x1xf32, #tpu.memory_space<vmem>>, vector<1x8x1xf32>
    %61 = vector.shape_cast %60 : vector<1x8x1xf32> to vector<8x1xf32>
    %c1_23 = arith.constant 1 : index
    %c0_24 = arith.constant 0 : index
    %c0_25 = arith.constant 0 : index
    %62 = vector.load %arg3[%c1_23, %c0_24, %c0_25] : memref<3x8x1xf32, #tpu.memory_space<vmem>>, vector<1x8x1xf32>
    %63 = vector.shape_cast %62 : vector<1x8x1xf32> to vector<8x1xf32>
    %c2_i32_26 = arith.constant 2 : i32
    %64 = tpu.dynamic_rotate %57 by %c2_i32_26 dim 1 : vector<16x128xf32>, i32 -> vector<16x128xf32>
    %c1_i32_27 = arith.constant 1 : i32
    %65 = tpu.dynamic_rotate %57 by %c1_i32_27 dim 1 : vector<16x128xf32>, i32 -> vector<16x128xf32>
    %c0_i32_28 = arith.constant 0 : i32
    %66 = tpu.dynamic_rotate %57 by %c0_i32_28 dim 1 : vector<16x128xf32>, i32 -> vector<16x128xf32>
    %c127_i32_29 = arith.constant 127 : i32
    %67 = tpu.dynamic_rotate %57 by %c127_i32_29 dim 1 : vector<16x128xf32>, i32 -> vector<16x128xf32>
    %c126_i32_30 = arith.constant 126 : i32
    %68 = tpu.dynamic_rotate %57 by %c126_i32_30 dim 1 : vector<16x128xf32>, i32 -> vector<16x128xf32>
    %69 = vector.extract_strided_slice %64 {offsets = [0, 0], sizes = [8, 128], strides = [1, 1]} : vector<16x128xf32> to vector<8x128xf32>
    %70 = vector.extract_strided_slice %65 {offsets = [0, 0], sizes = [8, 128], strides = [1, 1]} : vector<16x128xf32> to vector<8x128xf32>
    %71 = vector.extract_strided_slice %66 {offsets = [0, 0], sizes = [8, 128], strides = [1, 1]} : vector<16x128xf32> to vector<8x128xf32>
    %72 = vector.extract_strided_slice %67 {offsets = [0, 0], sizes = [8, 128], strides = [1, 1]} : vector<16x128xf32> to vector<8x128xf32>
    %73 = vector.extract_strided_slice %68 {offsets = [0, 0], sizes = [8, 128], strides = [1, 1]} : vector<16x128xf32> to vector<8x128xf32>
    %74 = tpu.concatenate %69, %70, %71, %72, %73 in 0 : vector<8x128xf32>, vector<8x128xf32>, vector<8x128xf32>, vector<8x128xf32>, vector<8x128xf32> -> vector<40x128xf32>
    %cst_31 = arith.constant dense<0.000000e+00> : vector<8x128xf32>
    %75 = tpu.matmul %59, %74, %cst_31 {dimension_numbers = #tpu.dot_dimension_numbers<[1], [0], [0], [1], [0, 0, 1, 1], [], []>} : vector<8x40xf32>, vector<40x128xf32>, vector<8x128xf32> -> vector<8x128xf32>
    %76 = vector.extract_strided_slice %64 {offsets = [8, 0], sizes = [8, 128], strides = [1, 1]} : vector<16x128xf32> to vector<8x128xf32>
    %77 = vector.extract_strided_slice %65 {offsets = [8, 0], sizes = [8, 128], strides = [1, 1]} : vector<16x128xf32> to vector<8x128xf32>
    %78 = vector.extract_strided_slice %66 {offsets = [8, 0], sizes = [8, 128], strides = [1, 1]} : vector<16x128xf32> to vector<8x128xf32>
    %79 = vector.extract_strided_slice %67 {offsets = [8, 0], sizes = [8, 128], strides = [1, 1]} : vector<16x128xf32> to vector<8x128xf32>
    %80 = vector.extract_strided_slice %68 {offsets = [8, 0], sizes = [8, 128], strides = [1, 1]} : vector<16x128xf32> to vector<8x128xf32>
    %81 = tpu.concatenate %76, %77, %78, %79, %80 in 0 : vector<8x128xf32>, vector<8x128xf32>, vector<8x128xf32>, vector<8x128xf32>, vector<8x128xf32> -> vector<40x128xf32>
    %cst_32 = arith.constant dense<0.000000e+00> : vector<8x128xf32>
    %82 = tpu.matmul %59, %81, %cst_32 {dimension_numbers = #tpu.dot_dimension_numbers<[1], [0], [0], [1], [0, 0, 1, 1], [], []>} : vector<8x40xf32>, vector<40x128xf32>, vector<8x128xf32> -> vector<8x128xf32>
    %83 = vector.shape_cast %75 : vector<8x128xf32> to vector<1x8x128xf32>
    %84 = vector.shape_cast %82 : vector<8x128xf32> to vector<1x8x128xf32>
    %85 = tpu.concatenate %83, %84 in 0 : vector<1x8x128xf32>, vector<1x8x128xf32> -> vector<2x8x128xf32>
    %cst_33 = arith.constant dense<0.000000e+00> : vector<8xf32>
    %86 = vector.multi_reduction <add>, %85, %cst_33 [0, 2] : vector<2x8x128xf32> to vector<8xf32>
    %87 = vector.shape_cast %86 : vector<8xf32> to vector<1x8x1xf32>
    %cst_34 = arith.constant 2.560000e+02 : f32
    %88 = vector.broadcast %cst_34 : f32 to vector<1x8x1xf32>
    %89 = arith.divf %87, %88 : vector<1x8x1xf32>
    %90 = arith.mulf %85, %85 : vector<2x8x128xf32>
    %cst_35 = arith.constant dense<0.000000e+00> : vector<8xf32>
    %91 = vector.multi_reduction <add>, %90, %cst_35 [0, 2] : vector<2x8x128xf32> to vector<8xf32>
    %92 = vector.shape_cast %91 : vector<8xf32> to vector<1x8x1xf32>
    %cst_36 = arith.constant 2.560000e+02 : f32
    %93 = vector.broadcast %cst_36 : f32 to vector<1x8x1xf32>
    %94 = arith.divf %92, %93 : vector<1x8x1xf32>
    %95 = arith.mulf %89, %89 : vector<1x8x1xf32>
    %96 = arith.subf %94, %95 : vector<1x8x1xf32>
    %97 = vector.shape_cast %61 : vector<8x1xf32> to vector<1x8x1xf32>
    %cst_37 = arith.constant 9.99999974E-6 : f32
    %98 = vector.broadcast %cst_37 : f32 to vector<1x8x1xf32>
    %99 = arith.addf %96, %98 : vector<1x8x1xf32>
    %100 = math.rsqrt %99 : vector<1x8x1xf32>
    %101 = arith.mulf %97, %100 : vector<1x8x1xf32>
    %102 = vector.shape_cast %63 : vector<8x1xf32> to vector<1x8x1xf32>
    %103 = arith.mulf %89, %101 : vector<1x8x1xf32>
    %104 = arith.subf %102, %103 : vector<1x8x1xf32>
    %105 = vector.broadcast %101 : vector<1x8x1xf32> to vector<2x8x128xf32>
    %106 = arith.mulf %85, %105 : vector<2x8x128xf32>
    %107 = vector.broadcast %104 : vector<1x8x1xf32> to vector<2x8x128xf32>
    %108 = arith.addf %106, %107 : vector<2x8x128xf32>
    %cst_38 = arith.constant 0.000000e+00 : f32
    %109 = vector.broadcast %cst_38 : f32 to vector<2x8x128xf32>
    %110 = arith.cmpf ogt, %108, %109 : vector<2x8x128xf32>
    %cst_39 = arith.constant 0.00999999977 : f32
    %111 = vector.broadcast %cst_39 : f32 to vector<2x8x128xf32>
    %112 = arith.mulf %111, %108 : vector<2x8x128xf32>
    %113 = arith.select %110, %108, %112 : vector<2x8x128xi1>, vector<2x8x128xf32>
    %114 = vector.shape_cast %113 : vector<2x8x128xf32> to vector<16x128xf32>
    %c2 = arith.constant 2 : index
    %c0_40 = arith.constant 0 : index
    %c0_41 = arith.constant 0 : index
    %115 = vector.load %arg1[%c2, %c0_40, %c0_41] : memref<3x8x40xf32, #tpu.memory_space<vmem>>, vector<1x8x40xf32>
    %116 = vector.shape_cast %115 : vector<1x8x40xf32> to vector<8x40xf32>
    %c2_42 = arith.constant 2 : index
    %c0_43 = arith.constant 0 : index
    %c0_44 = arith.constant 0 : index
    %117 = vector.load %arg2[%c2_42, %c0_43, %c0_44] : memref<3x8x1xf32, #tpu.memory_space<vmem>>, vector<1x8x1xf32>
    %118 = vector.shape_cast %117 : vector<1x8x1xf32> to vector<8x1xf32>
    %c2_45 = arith.constant 2 : index
    %c0_46 = arith.constant 0 : index
    %c0_47 = arith.constant 0 : index
    %119 = vector.load %arg3[%c2_45, %c0_46, %c0_47] : memref<3x8x1xf32, #tpu.memory_space<vmem>>, vector<1x8x1xf32>
    %120 = vector.shape_cast %119 : vector<1x8x1xf32> to vector<8x1xf32>
    %c2_i32_48 = arith.constant 2 : i32
    %121 = tpu.dynamic_rotate %114 by %c2_i32_48 dim 1 : vector<16x128xf32>, i32 -> vector<16x128xf32>
    %c1_i32_49 = arith.constant 1 : i32
    %122 = tpu.dynamic_rotate %114 by %c1_i32_49 dim 1 : vector<16x128xf32>, i32 -> vector<16x128xf32>
    %c0_i32_50 = arith.constant 0 : i32
    %123 = tpu.dynamic_rotate %114 by %c0_i32_50 dim 1 : vector<16x128xf32>, i32 -> vector<16x128xf32>
    %c127_i32_51 = arith.constant 127 : i32
    %124 = tpu.dynamic_rotate %114 by %c127_i32_51 dim 1 : vector<16x128xf32>, i32 -> vector<16x128xf32>
    %c126_i32_52 = arith.constant 126 : i32
    %125 = tpu.dynamic_rotate %114 by %c126_i32_52 dim 1 : vector<16x128xf32>, i32 -> vector<16x128xf32>
    %126 = vector.extract_strided_slice %121 {offsets = [0, 0], sizes = [8, 128], strides = [1, 1]} : vector<16x128xf32> to vector<8x128xf32>
    %127 = vector.extract_strided_slice %122 {offsets = [0, 0], sizes = [8, 128], strides = [1, 1]} : vector<16x128xf32> to vector<8x128xf32>
    %128 = vector.extract_strided_slice %123 {offsets = [0, 0], sizes = [8, 128], strides = [1, 1]} : vector<16x128xf32> to vector<8x128xf32>
    %129 = vector.extract_strided_slice %124 {offsets = [0, 0], sizes = [8, 128], strides = [1, 1]} : vector<16x128xf32> to vector<8x128xf32>
    %130 = vector.extract_strided_slice %125 {offsets = [0, 0], sizes = [8, 128], strides = [1, 1]} : vector<16x128xf32> to vector<8x128xf32>
    %131 = tpu.concatenate %126, %127, %128, %129, %130 in 0 : vector<8x128xf32>, vector<8x128xf32>, vector<8x128xf32>, vector<8x128xf32>, vector<8x128xf32> -> vector<40x128xf32>
    %cst_53 = arith.constant dense<0.000000e+00> : vector<8x128xf32>
    %132 = tpu.matmul %116, %131, %cst_53 {dimension_numbers = #tpu.dot_dimension_numbers<[1], [0], [0], [1], [0, 0, 1, 1], [], []>} : vector<8x40xf32>, vector<40x128xf32>, vector<8x128xf32> -> vector<8x128xf32>
    %133 = vector.extract_strided_slice %121 {offsets = [8, 0], sizes = [8, 128], strides = [1, 1]} : vector<16x128xf32> to vector<8x128xf32>
    %134 = vector.extract_strided_slice %122 {offsets = [8, 0], sizes = [8, 128], strides = [1, 1]} : vector<16x128xf32> to vector<8x128xf32>
    %135 = vector.extract_strided_slice %123 {offsets = [8, 0], sizes = [8, 128], strides = [1, 1]} : vector<16x128xf32> to vector<8x128xf32>
    %136 = vector.extract_strided_slice %124 {offsets = [8, 0], sizes = [8, 128], strides = [1, 1]} : vector<16x128xf32> to vector<8x128xf32>
    %137 = vector.extract_strided_slice %125 {offsets = [8, 0], sizes = [8, 128], strides = [1, 1]} : vector<16x128xf32> to vector<8x128xf32>
    %138 = tpu.concatenate %133, %134, %135, %136, %137 in 0 : vector<8x128xf32>, vector<8x128xf32>, vector<8x128xf32>, vector<8x128xf32>, vector<8x128xf32> -> vector<40x128xf32>
    %cst_54 = arith.constant dense<0.000000e+00> : vector<8x128xf32>
    %139 = tpu.matmul %116, %138, %cst_54 {dimension_numbers = #tpu.dot_dimension_numbers<[1], [0], [0], [1], [0, 0, 1, 1], [], []>} : vector<8x40xf32>, vector<40x128xf32>, vector<8x128xf32> -> vector<8x128xf32>
    %140 = vector.shape_cast %132 : vector<8x128xf32> to vector<1x8x128xf32>
    %141 = vector.shape_cast %139 : vector<8x128xf32> to vector<1x8x128xf32>
    %142 = tpu.concatenate %140, %141 in 0 : vector<1x8x128xf32>, vector<1x8x128xf32> -> vector<2x8x128xf32>
    %cst_55 = arith.constant dense<0.000000e+00> : vector<8xf32>
    %143 = vector.multi_reduction <add>, %142, %cst_55 [0, 2] : vector<2x8x128xf32> to vector<8xf32>
    %144 = vector.shape_cast %143 : vector<8xf32> to vector<1x8x1xf32>
    %cst_56 = arith.constant 2.560000e+02 : f32
    %145 = vector.broadcast %cst_56 : f32 to vector<1x8x1xf32>
    %146 = arith.divf %144, %145 : vector<1x8x1xf32>
    %147 = arith.mulf %142, %142 : vector<2x8x128xf32>
    %cst_57 = arith.constant dense<0.000000e+00> : vector<8xf32>
    %148 = vector.multi_reduction <add>, %147, %cst_57 [0, 2] : vector<2x8x128xf32> to vector<8xf32>
    %149 = vector.shape_cast %148 : vector<8xf32> to vector<1x8x1xf32>
    %cst_58 = arith.constant 2.560000e+02 : f32
    %150 = vector.broadcast %cst_58 : f32 to vector<1x8x1xf32>
    %151 = arith.divf %149, %150 : vector<1x8x1xf32>
    %152 = arith.mulf %146, %146 : vector<1x8x1xf32>
    %153 = arith.subf %151, %152 : vector<1x8x1xf32>
    %154 = vector.shape_cast %118 : vector<8x1xf32> to vector<1x8x1xf32>
    %cst_59 = arith.constant 9.99999974E-6 : f32
    %155 = vector.broadcast %cst_59 : f32 to vector<1x8x1xf32>
    %156 = arith.addf %153, %155 : vector<1x8x1xf32>
    %157 = math.rsqrt %156 : vector<1x8x1xf32>
    %158 = arith.mulf %154, %157 : vector<1x8x1xf32>
    %159 = vector.shape_cast %120 : vector<8x1xf32> to vector<1x8x1xf32>
    %160 = arith.mulf %146, %158 : vector<1x8x1xf32>
    %161 = arith.subf %159, %160 : vector<1x8x1xf32>
    %162 = vector.broadcast %158 : vector<1x8x1xf32> to vector<2x8x128xf32>
    %163 = arith.mulf %142, %162 : vector<2x8x128xf32>
    %164 = vector.broadcast %161 : vector<1x8x1xf32> to vector<2x8x128xf32>
    %165 = arith.addf %163, %164 : vector<2x8x128xf32>
    %cst_60 = arith.constant 0.000000e+00 : f32
    %166 = vector.broadcast %cst_60 : f32 to vector<2x8x128xf32>
    %167 = arith.cmpf ogt, %165, %166 : vector<2x8x128xf32>
    %cst_61 = arith.constant 0.00999999977 : f32
    %168 = vector.broadcast %cst_61 : f32 to vector<2x8x128xf32>
    %169 = arith.mulf %168, %165 : vector<2x8x128xf32>
    %170 = arith.select %167, %165, %169 : vector<2x8x128xi1>, vector<2x8x128xf32>
    %c0_62 = arith.constant 0 : index
    %c0_63 = arith.constant 0 : index
    %c0_64 = arith.constant 0 : index
    %171 = vector.load %arg4[%c0_62, %c0_63, %c0_64] : memref<2x8x128xf32, #tpu.memory_space<vmem>>, vector<2x8x128xf32>
    tpu.vector_store %arg4[%c0_62, %c0_63, %c0_64], %170 {strides = array<i32>} : memref<2x8x128xf32, #tpu.memory_space<vmem>>, vector<2x8x128xf32>,
    return
  }
}

</mosaic_0001>

<bundles_post_ra>
// kernel: periodic_conv1d_block.1
= control target key start
LH: loop header
LB: loop body
LE: loop exit
PB: predicated region body
PF: predicated region fallthrough
CT: control target
= control target key end

     0   :  { %s592_s0 = inlined_call_operand.vmem [shape: f32[16,128], index: 0, kind: input, shape index: {}]   ;;  %s593_s1 = inlined_call_operand.vmem [shape: f32[3,8,40], index: 1, kind: input, shape index: {}]   ;;  %s594_s2 = inlined_call_operand.vmem [shape: f32[3,8,1], index: 2, kind: input, shape index: {}]   ;;  %s595_s3 = inlined_call_operand.vmem [shape: f32[3,8,1], index: 3, kind: input, shape index: {}]   ;;  %s596_s4 = inlined_call_operand.hbm [shape: f32[2,8,128], index: 4, kind: output, shape index: {}]  }
   0x1   :  { %v18_v0 = vld [vmem:[%s592_s0] sm:$0xff]  ;;  %v19_v1 = vld [vmem:[%s592_s0 + $0x8] sm:$0xff] }
   0x2   :  { %9 = vsyncpa [#allocation3], 0  ;;  %v399_v2 = vpack.i.bf16 %v19_v1, %v18_v0  ;;  %s496_s19 = smov 126   ;;  %s497_s20 = smov 1   ;;  %v20_v15 = vld [vmem:[%s593_s1] sm:$0xff]  ;;  %vm39_vm0 = vcmask 326656  }
   0x3   :  { %s498_s21 = smov 127   ;;  %s499_s22 = smov 2   ;;  %v500_v22 = vmov 256.0   ;;  %v501_v27 = vmov 0   ;;  %v21_v42 = vld [vmem:[%s594_s2] sm:$0xff] }
   0x4   :  { %400 = vrot.lane.b32.xlu0 %v399_v2, %s496_s19  ;;  %410 = vrot.lane.b32.xlu1 %v399_v2, %s497_s20  ;;  %462 = vrcp.f32 %v500_v22  ;;  %v22_v46 = vld [vmem:[%s595_s3] sm:$0xff]  ;;  %s502_s13 = smov [#allocation2]   ;;  %s366_s16 = sshll.u32 %s596_s4, 4  ;;  %s367_s16 = int_to_ptr.hbm [resolvable:$true] %s366_s16 }
   0x5   :  { %419 = vset.pattern.permute.xlu0 %v501_v27  ;;  %420 = vset.pattern.permute.xlu1 %v501_v27  ;;  %s504_s17 = smov 8  }
   0x6   :  { %441 = vset.pattern.permute.xlu2 %v501_v27  ;;  %v381_v27 = vld [vmem:[%s594_s2 + $0x8] sm:$0xff] }
   0xa   :  { %v463_v23 = vpop.eup %462 }
   0xb   :  { %v87_v24 = vmul.f32 256.0, %v463_v23  ;;  %vm91_vm1 = vweird.f32 %v463_v23 }
   0xc   :  { %405 = vrot.lane.b32.xlu0 %v399_v2, %s498_s21  ;;  %415 = vrot.lane.b32.xlu1 %v399_v2, %s499_s22 }
   0xd   :  { %v88_v25 = vsub.f32 1.0, %v87_v24 }
   0xf   :  { %v89_v26 = vmul.f32 %v463_v23, %v88_v25 }
  0x11   :  { %v90_v28 = vadd.f32 %v463_v23, %v89_v26 }
  0x13   :  { %v545_v30 = vsel %vm91_vm1, %v463_v23, %v90_v28 }
  0x76   :  { %v401_v3 = vpop.permute.xlu0 %400  ;;  %v411_v4 = vpop.permute.xlu1 %410 }
  0x77   :  { %v402_v5 = vunpack.i.l.bf16 %v401_v3  ;;  %v403_v6 = vunpack.i.h.bf16 %v401_v3  ;;  %v412_v11 = vunpack.i.l.bf16 %v411_v4  ;;  %v413_v12 = vunpack.i.h.bf16 %v411_v4 }
  0x79   :  { %54 = vmatpush.msra.mxu0 %v402_v5  ;;  %74 = vmatpush.msra.mxu1 %v403_v6 }
  0x7e   :  { %v406_v7 = vpop.permute.xlu0 %405  ;;  %v416_v10 = vpop.permute.xlu1 %415 }
  0x7f   :  { %v407_v8 = vunpack.i.l.bf16 %v406_v7  ;;  %v408_v9 = vunpack.i.h.bf16 %v406_v7  ;;  %v417_v13 = vunpack.i.l.bf16 %v416_v10  ;;  %v418_v14 = vunpack.i.h.bf16 %v416_v10 }
  0x81   :  { %55 = vmatpush.msra.mxu0 %v407_v8  ;;  %75 = vmatpush.msra.mxu1 %v408_v9  ;;  %v380_v8 = vld [vmem:[%s593_s1 + $0x8] sm:$0xff] }
  0x83   :  { %56 = vmatpush.msra.mxu0 %v18_v0  ;;  %76 = vmatpush.msra.mxu1 %v19_v1 }
  0x85   :  { %57 = vmatpush.msra.mxu0 %v412_v11  ;;  %77 = vmatpush.msra.mxu1 %v413_v12 }
  0x87   :  { %58 = vmatpush.msra.mxu0 %v417_v13  ;;  %78 = vmatpush.msra.mxu1 %v418_v14 }
  0x88   :  { %378 = vmatmul.msk.f32.vlgmr.msra.gmra.mxu0 %vm39_vm0, %v20_v15  ;;  %379 = vmatmul.msk.f32.vlgmr.msra.gmra.mxu1 %vm39_vm0, %v20_v15 }
 0x105   :  { %v60_v16 = vpop.f32.mrf.mxu0  ;;  %v80_v17 = vpop.f32.mrf.mxu1 }
 0x106   :  { %v83_v18 = vadd.f32 %v80_v17, %v60_v16  ;;  %v94_v19 = vmul.f32 %v60_v16, %v60_v16  ;;  %v95_v20 = vmul.f32 %v80_v17, %v80_v17 }
 0x108   :  { %84 = vadd.xlane.f32.xlu2 %v83_v18  ;;  %v96_v21 = vadd.f32 %v95_v20, %v94_v19 }
 0x110   :  { %97 = vadd.xlane.f32.xlu2 %v96_v21 }
 0x17b   :  { %v85_v29 = vpop.xlane.xlu2 %84 }
 0x17c   :  { %v93_v31 = vmul.f32 %v545_v30, %v85_v29 }
 0x17e   :  { %v100_v33 = vmul.f32 %v93_v31, %v93_v31 }
 0x183   :  { %v98_v32 = vpop.xlane.xlu2 %97 }
 0x184   :  { %v99_v34 = vmul.f32 %v98_v32, %v545_v30 }
 0x186   :  { %v101_v35 = vsub.f32 %v99_v34, %v100_v33  ;;  %v382_v33 = vld [vmem:[%s595_s3 + $0x8] sm:$0xff] }
 0x188   :  { %v102_v36 = vadd.f32 1e-05, %v101_v35 }
 0x18a   :  { %464 = vrsqrt.f32 %v102_v36  ;;  %vm109_vm3 = vweird.f32 %v102_v36 }
 0x190   :  { %v465_v37 = vpop.eup %464 }
 0x191   :  { %v104_v38 = vmul.f32 %v465_v37, %v102_v36  ;;  %vm110_vm2 = vweird.f32 %v465_v37 }
 0x192   :  { %vm111_vm4 = vmor %vm109_vm3, %vm110_vm2 }
 0x193   :  { %v105_v39 = vmul.f32 %v465_v37, %v104_v38 }
 0x195   :  { %v106_v40 = vmul.f32 0.5, %v105_v39 }
 0x197   :  { %v107_v41 = vsub.f32 1.5, %v106_v40 }
 0x199   :  { %v108_v43 = vmul.f32 %v465_v37, %v107_v41 }
 0x19b   :  { %v112_v44 = vsel %vm111_vm4, %v465_v37, %v108_v43 }
 0x19c   :  { %v113_v45 = vmul.f32 %v112_v44, %v21_v42 }
 0x19e   :  { %118 = vperm.xlu0 %419, %v113_v45   ;;  %v114_v47 = vmul.f32 %v113_v45, %v93_v31 }
 0x1a0   :  { %v115_v48 = vsub.f32 %v22_v46, %v114_v47 }
 0x1a2   :  { %125 = vperm.xlu1 %420, %v115_v48  }
 0x210   :  { %v119_v49 = vpop.permute.xlu0 %118 }
 0x211   :  { %v121_v50 = vmul.f32 %v119_v49, %v60_v16  ;;  %v122_v51 = vmul.f32 %v119_v49, %v80_v17 }
 0x214   :  { %v126_v52 = vpop.permute.xlu1 %125 }
 0x215   :  { %v128_v53 = vadd.f32 %v126_v52, %v121_v50  ;;  %v129_v54 = vadd.f32 %v126_v52, %v122_v51 }
 0x217   :  { %vm130_vm5 = vcmp.gt.f32.partialorder %v128_v53, 0.0  ;;  %vm131_vm6 = vcmp.gt.f32.partialorder %v129_v54, 0.0  ;;  %v132_v55 = vmul.f32 0.01, %v128_v53  ;;  %v133_v56 = vmul.f32 0.01, %v129_v54 }
 0x219   :  { %v134_v57 = vsel %vm130_vm5, %v128_v53, %v132_v55  ;;  %v135_v58 = vsel %vm131_vm6, %v129_v54, %v133_v56 }
 0x21a   :  { %v431_v59 = vpack.i.bf16 %v135_v58, %v134_v57 }
 0x21c   :  { %432 = vrot.lane.b32.xlu0 %v431_v59, %s497_s20  ;;  %427 = vrot.lane.b32.xlu1 %v431_v59, %s498_s21 }
 0x21d   :  { %422 = vrot.lane.b32.xlu2 %v431_v59, %s496_s19 }
 0x224   :  { %437 = vrot.lane.b32.xlu1 %v431_v59, %s499_s22 }
 0x277   :  { %v423_v60 = vpop.permute.xlu2 %422 }
 0x278   :  { %v424_v61 = vunpack.i.l.bf16 %v423_v60  ;;  %v425_v62 = vunpack.i.h.bf16 %v423_v60 }
 0x27a   :  { %172 = vmatpush.msra.mxu2 %v424_v61  ;;  %192 = vmatpush.msra.mxu3 %v425_v62 }
 0x28e   :  { %v428_v63 = vpop.permute.xlu1 %427  ;;  %v433_v2 = vpop.permute.xlu0 %432 }
 0x28f   :  { %v429_v0 = vunpack.i.l.bf16 %v428_v63  ;;  %v430_v1 = vunpack.i.h.bf16 %v428_v63  ;;  %v434_v3 = vunpack.i.l.bf16 %v433_v2  ;;  %v435_v4 = vunpack.i.h.bf16 %v433_v2 }
 0x291   :  { %173 = vmatpush.msra.mxu2 %v429_v0  ;;  %193 = vmatpush.msra.mxu3 %v430_v1 }
 0x293   :  { %174 = vmatpush.msra.mxu2 %v134_v57  ;;  %194 = vmatpush.msra.mxu3 %v135_v58  ;;  %v385_v58 = vld [vmem:[%s593_s1 + $0x10] sm:$0xff] }
 0x295   :  { %175 = vmatpush.msra.mxu2 %v434_v3  ;;  %195 = vmatpush.msra.mxu3 %v435_v4 }
 0x296   :  { %v438_v5 = vpop.permute.xlu1 %437 }
 0x297   :  { %v439_v6 = vunpack.i.l.bf16 %v438_v5  ;;  %v440_v7 = vunpack.i.h.bf16 %v438_v5 }
 0x299   :  { %176 = vmatpush.msra.mxu2 %v439_v6  ;;  %196 = vmatpush.msra.mxu3 %v440_v7 }
 0x29a   :  { %383 = vmatmul.msk.f32.vlgmr.msra.gmra.mxu2 %vm39_vm0, %v380_v8  ;;  %384 = vmatmul.msk.f32.vlgmr.msra.gmra.mxu3 %vm39_vm0, %v380_v8 }
 0x31d   :  { %v178_v9 = vpop.f32.mrf.mxu2  ;;  %v198_v10 = vpop.f32.mrf.mxu3 }
 0x31e   :  { %v205_v11 = vmul.f32 %v178_v9, %v178_v9  ;;  %v206_v12 = vmul.f32 %v198_v10, %v198_v10  ;;  %v201_v13 = vadd.f32 %v198_v10, %v178_v9 }
 0x320   :  { %202 = vadd.xlane.f32.xlu0 %v201_v13  ;;  %v207_v14 = vadd.f32 %v206_v12, %v205_v11  ;;  %v386_v13 = vld [vmem:[%s594_s2 + $0x10] sm:$0xff]  ;;  %s364_s2 = sshll.u32 %s502_s13, 4  ;;  %s365_s2 = int_to_ptr.vmem [resolvable:$true] %s364_s2 }
 0x322   :  { %208 = vadd.xlane.f32.xlu1 %v207_v14 }
 0x393   :  { %v203_v15 = vpop.xlane.xlu0 %202 }
 0x394   :  { %v204_v16 = vmul.f32 %v203_v15, %v545_v30 }
 0x395   :  { %v209_v17 = vpop.xlane.xlu1 %208 }
 0x396   :  { %v211_v18 = vmul.f32 %v204_v16, %v204_v16  ;;  %v210_v19 = vmul.f32 %v209_v17, %v545_v30 }
 0x398   :  { %v212_v20 = vsub.f32 %v210_v19, %v211_v18 }
 0x39a   :  { %v213_v21 = vadd.f32 1e-05, %v212_v20 }
 0x39c   :  { %466 = vrsqrt.f32 %v213_v21  ;;  %vm220_vm8 = vweird.f32 %v213_v21 }
 0x3a2   :  { %v467_v22 = vpop.eup %466 }
 0x3a3   :  { %v215_v23 = vmul.f32 %v467_v22, %v213_v21  ;;  %vm221_vm7 = vweird.f32 %v467_v22 }
 0x3a4   :  { %vm222_vm9 = vmor %vm220_vm8, %vm221_vm7 }
 0x3a5   :  { %v216_v24 = vmul.f32 %v467_v22, %v215_v23 }
 0x3a7   :  { %v217_v25 = vmul.f32 0.5, %v216_v24 }
 0x3a9   :  { %v218_v26 = vsub.f32 1.5, %v217_v25 }
 0x3ab   :  { %v219_v28 = vmul.f32 %v467_v22, %v218_v26 }
 0x3ad   :  { %v223_v29 = vsel %vm222_vm9, %v467_v22, %v219_v28 }
 0x3ae   :  { %v224_v31 = vmul.f32 %v381_v27, %v223_v29 }
 0x3b0   :  { %229 = vperm.xlu2 %441, %v224_v31   ;;  %v225_v32 = vmul.f32 %v224_v31, %v204_v16 }
 0x3b2   :  { %v226_v34 = vsub.f32 %v382_v33, %v225_v32 }
 0x3b8   :  { %236 = vperm.xlu2 %441, %v226_v34  }
 0x40a   :  { %v230_v35 = vpop.permute.xlu2 %229 }
 0x40b   :  { %v232_v36 = vmul.f32 %v230_v35, %v178_v9  ;;  %v233_v37 = vmul.f32 %v230_v35, %v198_v10 }
 0x412   :  { %v237_v38 = vpop.permute.xlu2 %236 }
 0x413   :  { %v239_v39 = vadd.f32 %v237_v38, %v232_v36  ;;  %v240_v40 = vadd.f32 %v237_v38, %v233_v37 }
 0x415   :  { %vm241_vm10 = vcmp.gt.f32.partialorder %v239_v39, 0.0  ;;  %vm242_vm11 = vcmp.gt.f32.partialorder %v240_v40, 0.0  ;;  %v243_v41 = vmul.f32 0.01, %v239_v39  ;;  %v244_v42 = vmul.f32 0.01, %v240_v40 }
 0x417   :  { %v245_v43 = vsel %vm241_vm10, %v239_v39, %v243_v41  ;;  %v246_v44 = vsel %vm242_vm11, %v240_v40, %v244_v42 }
 0x418   :  { %v442_v45 = vpack.i.bf16 %v246_v44, %v245_v43 }
 0x41a   :  { %443 = vrot.lane.b32.xlu2 %v442_v45, %s496_s19 }
 0x422   :  { %448 = vrot.lane.b32.xlu2 %v442_v45, %s498_s21 }
 0x42a   :  { %453 = vrot.lane.b32.xlu2 %v442_v45, %s497_s20 }
 0x432   :  { %458 = vrot.lane.b32.xlu2 %v442_v45, %s499_s22 }
 0x474   :  { %v444_v46 = vpop.permute.xlu2 %443 }
 0x475   :  { %v445_v47 = vunpack.i.l.bf16 %v444_v46  ;;  %v446_v48 = vunpack.i.h.bf16 %v444_v46 }
 0x477   :  { %283 = vmatpush.msrb.mxu0 %v445_v47  ;;  %303 = vmatpush.msrb.mxu1 %v446_v48 }
 0x47c   :  { %v449_v49 = vpop.permute.xlu2 %448 }
 0x47d   :  { %v450_v50 = vunpack.i.l.bf16 %v449_v49  ;;  %v451_v51 = vunpack.i.h.bf16 %v449_v49 }
 0x47f   :  { %284 = vmatpush.msrb.mxu0 %v450_v50  ;;  %304 = vmatpush.msrb.mxu1 %v451_v51 }
 0x481   :  { %285 = vmatpush.msrb.mxu0 %v245_v43  ;;  %305 = vmatpush.msrb.mxu1 %v246_v44 }
 0x484   :  { %v454_v52 = vpop.permute.xlu2 %453 }
 0x485   :  { %v455_v53 = vunpack.i.l.bf16 %v454_v52  ;;  %v456_v54 = vunpack.i.h.bf16 %v454_v52 }
 0x487   :  { %286 = vmatpush.msrb.mxu0 %v455_v53  ;;  %306 = vmatpush.msrb.mxu1 %v456_v54 }
 0x48c   :  { %v459_v55 = vpop.permute.xlu2 %458 }
 0x48d   :  { %v460_v56 = vunpack.i.l.bf16 %v459_v55  ;;  %v461_v57 = vunpack.i.h.bf16 %v459_v55 }
 0x48f   :  { %287 = vmatpush.msrb.mxu0 %v460_v56  ;;  %307 = vmatpush.msrb.mxu1 %v461_v57 }
 0x490   :  { %388 = vmatmul.msk.f32.vlgmr.msrb.gmra.mxu0 %vm39_vm0, %v385_v58  ;;  %389 = vmatmul.msk.f32.vlgmr.msrb.gmra.mxu1 %vm39_vm0, %v385_v58 }
 0x50d   :  { %v289_v59 = vpop.f32.mrf.mxu0  ;;  %v309_v60 = vpop.f32.mrf.mxu1 }
 0x50e   :  { %v316_v61 = vmul.f32 %v289_v59, %v289_v59  ;;  %v317_v62 = vmul.f32 %v309_v60, %v309_v60  ;;  %v312_v63 = vadd.f32 %v309_v60, %v289_v59 }
 0x510   :  { %313 = vadd.xlane.f32.xlu0 %v312_v63  ;;  %v318_v0 = vadd.f32 %v317_v62, %v316_v61 }
 0x512   :  { %319 = vadd.xlane.f32.xlu1 %v318_v0 }
 0x583   :  { %v314_v1 = vpop.xlane.xlu0 %313 }
 0x584   :  { %v315_v2 = vmul.f32 %v314_v1, %v545_v30 }
 0x585   :  { %v320_v3 = vpop.xlane.xlu1 %319 }
 0x586   :  { %v322_v4 = vmul.f32 %v315_v2, %v315_v2  ;;  %v321_v5 = vmul.f32 %v320_v3, %v545_v30  ;;  %v387_v30 = vld [vmem:[%s595_s3 + $0x10] sm:$0xff]  ;;  %s503_s3 = smov 128  }
 0x588   :  { %v323_v6 = vsub.f32 %v321_v5, %v322_v4 }
 0x58a   :  { %v324_v7 = vadd.f32 1e-05, %v323_v6 }
 0x58c   :  { %468 = vrsqrt.f32 %v324_v7  ;;  %vm331_vm13 = vweird.f32 %v324_v7 }
 0x592   :  { %v469_v8 = vpop.eup %468 }
 0x593   :  { %v326_v9 = vmul.f32 %v469_v8, %v324_v7  ;;  %vm332_vm12 = vweird.f32 %v469_v8 }
 0x594   :  { %vm333_vm14 = vmor %vm331_vm13, %vm332_vm12 }
 0x595   :  { %v327_v10 = vmul.f32 %v469_v8, %v326_v9 }
 0x597   :  { %v328_v11 = vmul.f32 0.5, %v327_v10 }
 0x599   :  { %v329_v12 = vsub.f32 1.5, %v328_v11 }
 0x59b   :  { %v330_v14 = vmul.f32 %v469_v8, %v329_v12 }
 0x59d   :  { %v334_v15 = vsel %vm333_vm14, %v469_v8, %v330_v14 }
 0x59e   :  { %v335_v16 = vmul.f32 %v386_v13, %v334_v15 }
 0x5a0   :  { %340 = vperm.xlu2 %441, %v335_v16   ;;  %v336_v17 = vmul.f32 %v335_v16, %v315_v2 }
 0x5a2   :  { %v337_v18 = vsub.f32 %v387_v30, %v336_v17 }
 0x5a4   :  { %347 = vperm.xlu0 %419, %v337_v18  }
 0x5fa   :  { %v341_v19 = vpop.permute.xlu2 %340 }
 0x5fb   :  { %v343_v20 = vmul.f32 %v341_v19, %v289_v59  ;;  %v344_v21 = vmul.f32 %v341_v19, %v309_v60 }
 0x616   :  { %v348_v22 = vpop.permute.xlu0 %347 }
 0x617   :  { %v350_v23 = vadd.f32 %v348_v22, %v343_v20  ;;  %v351_v24 = vadd.f32 %v348_v22, %v344_v21 }
 0x619   :  { %vm352_vm15 = vcmp.gt.f32.partialorder %v350_v23, 0.0  ;;  %vm353_vm0 = vcmp.gt.f32.partialorder %v351_v24, 0.0  ;;  %v354_v25 = vmul.f32 0.01, %v350_v23  ;;  %v355_v26 = vmul.f32 0.01, %v351_v24 }
 0x61b   :  { %v356_v27 = vsel %vm352_vm15, %v350_v23, %v354_v25  ;;  %v357_v28 = vsel %vm353_vm0, %v351_v24, %v355_v26 }
 0x61c   :  { %358 = vst [vmem:[#allocation2] sm:$0xff] %v356_v27 }
 0x61d   :  { %359 = vst [vmem:[#allocation2 + $0x8] sm:$0xff] %v357_v28 }
 0x61e   :  { %372 = dma.vmem_to_hbm [thread:$0]  %s365_s2, 256, %s367_s16, [#allocation3], %s503_s3, %s503_s3, %s504_s17  }
 0x61f   :  { %494 = dma.done.wait [#allocation3], 256  }
 0x620   :  { %495 = vsyncadd [#allocation3], 4294967040 }
 0x621   :  { %377 = vsyncpa [#allocation3], 1 }

</bundles_post_ra>
